<compile_context>
chip_gen: v7x
topology: tpu7x:2x2x1
jax: 0.10.0
libtpu: 0.0.40
codegen_flags: <defaults>
</compile_context>

<pallas_src>
import functools
import inspect

import jax
import jax.numpy as jnp
from jax.experimental import pallas as pl
from jax.experimental.pallas import tpu as pltpu


def _round_up(x, m):
    return ((x + m - 1) // m) * m


_SUPPORTS_PIPELINE_MODE = (
    hasattr(pl, "Buffered")
    and "pipeline_mode" in inspect.signature(pl.BlockSpec).parameters
)


def _discrete_decoder_kernel(inv_temp_ref, x_ref, w_mlp_ref, b_mlp_ref,
                             w_proto_ref, hat_y_ref, z_ref,
                             *, alpha, num_classes, approx_recip):
    # inv_temp_ref: (1,)          f32, SMEM  (1 / temperature)
    # x_ref:        (TB, F)       activations tile (bf16)
    # w_mlp_ref:    (F, D_pad)    mlp weight, pre-transposed + lane-padded (bf16)
    # b_mlp_ref:    (1, D_pad)    mlp bias (f32)
    # w_proto_ref:  (D_pad, C_pad) class prototypes, lane-padded (bf16)
    # hat_y_ref:    (TB, C_pad)   output probabilities (f32)
    # z_ref:        (TB, D_pad)   output embedding (f32)
    x = x_ref[...]

    # z = x @ W_mlp.T + b   (MXU, f32 accumulate)
    z = jnp.dot(x, w_mlp_ref[...], preferred_element_type=jnp.float32)
    z = z + b_mlp_ref[...]

    # logits = (z @ prototypes) * inv_temperature   (no vector divide)
    logits = jnp.dot(z.astype(w_proto_ref.dtype), w_proto_ref[...],
                     preferred_element_type=jnp.float32)
    logits = logits * inv_temp_ref[0]

    # Exclude lane-padded prototype columns from the softmax.
    c_pad = logits.shape[-1]
    if num_classes < c_pad:
        col = jax.lax.broadcasted_iota(jnp.int32, logits.shape, dimension=1)
        logits = jnp.where(col < num_classes, logits, -jnp.inf)

    # Numerically-stable softmax; per-row reciprocal (EUP) instead of a
    # (TB, C) vector divide, with (1 - alpha) folded into the row scale so
    # label smoothing is a single multiply-add.
    m = jnp.max(logits, axis=-1, keepdims=True)
    e = jnp.exp(logits - m)
    l = jnp.sum(e, axis=-1, keepdims=True)
    inv_l = pl.reciprocal(l, approx=approx_recip)
    hat_y = e * ((1.0 - alpha) * inv_l) + (alpha / num_classes)

    # TODO(synk): PyTorch's runtime NaN/Inf asserts have no prod-mode Pallas
    # equivalent (pl.debug_check is a no-op outside debug-check mode).
    hat_y_ref[...] = hat_y.astype(hat_y_ref.dtype)
    z_ref[...] = z.astype(z_ref.dtype)


def prepare_discrete_decoder_params(w_mlp, b_mlp, w_proto, temperature,
                                    compute_dtype=jnp.bfloat16):
    """One-time weight prep (transpose / lane-pad / cast) so per-call work is
    only the kernel.  PyTorch layouts:
      w_mlp:   (D, F)  nn.Linear(feature_dim, output_dim).weight
      b_mlp:   (D,)    its bias
      w_proto: (D, C)  nn.Linear(num_classes, output_dim, bias=False).weight
    """
    D, F = w_mlp.shape
    D2, C = w_proto.shape
    assert D == D2, "output_dim mismatch between mlp weight and prototypes"

    d_pad = _round_up(D, 128)
    c_pad = _round_up(C, 128)

    w_mlp_t = jnp.pad(jnp.asarray(w_mlp, jnp.float32).T,
                      ((0, 0), (0, d_pad - D))).astype(compute_dtype)      # (F, D_pad)
    b_row = jnp.pad(jnp.asarray(b_mlp, jnp.float32).reshape(1, D),
                    ((0, 0), (0, d_pad - D)))                              # (1, D_pad) f32
    w_proto_p = jnp.pad(jnp.asarray(w_proto, jnp.float32),
                        ((0, d_pad - D), (0, c_pad - C))).astype(compute_dtype)  # (D_pad, C_pad)
    inv_temp = (1.0 / jnp.asarray(temperature, jnp.float32)).reshape(1)    # (1,) f32

    return dict(w_mlp_t=w_mlp_t, b_mlp=b_row, w_proto=w_proto_p,
                inv_temp=inv_temp, feature_dim=F, output_dim=D,
                num_classes=C, compute_dtype=compute_dtype)


def discrete_decoder_apply(params, e_xk, smoothing_factor=0.1, *,
                           block_b=1024, approx_reciprocal=True,
                           single_buffer_weights=True):
    """Apply the fused decoder kernel.  e_xk: (B, 1, F).  Returns (hat_y, z)."""
    compute_dtype = params["compute_dtype"]
    x = jnp.squeeze(e_xk, axis=1).astype(compute_dtype)                    # (B, F)
    B, F = x.shape
    assert F == params["feature_dim"]
    D, C = params["output_dim"], params["num_classes"]
    d_pad = params["w_mlp_t"].shape[1]
    c_pad = params["w_proto"].shape[1]

    # Batch tile: multiple of 8 sublanes; keep >= ~4 grid steps so both v7x
    # TensorCores get work and the pipeline overlaps DMA with compute.
    if B <= 8:
        TB = B
    else:
        TB = max(8, min(block_b, _round_up(pl.cdiv(B, 4), 8)))
        TB = min(TB, _round_up(B, 8))
    grid = (pl.cdiv(B, TB),)

    # Explicit VMEM budget: weights (<=2 buffers) + double-buffered I/O tiles
    # + elementwise intermediates + headroom, clamped to [32, 64] MiB so it is
    # valid on every generation (v5e/v6e/v7x).
    in_bytes = jnp.dtype(compute_dtype).itemsize
    weight_bytes = ((F * d_pad + d_pad * c_pad) * in_bytes + d_pad * 4) * 2
    tile_bytes = 2 * TB * (F * in_bytes + (d_pad + c_pad) * 4)
    interm_bytes = 4 * TB * c_pad * 4
    vmem_limit = int(min(64 << 20,
                         max(32 << 20,
                             weight_bytes + tile_bytes + interm_bytes + (4 << 20))))

    kernel = functools.partial(_discrete_decoder_kernel,
                               alpha=float(smoothing_factor),
                               num_classes=int(C),
                               approx_recip=bool(approx_reciprocal))

    def _resident_spec(block_shape, single_buffer):
        index_map = lambda i: (0,) * len(block_shape)
        if single_buffer and _SUPPORTS_PIPELINE_MODE:
            return pl.BlockSpec(block_shape, index_map,
                                pipeline_mode=pl.Buffered(1))
        return pl.BlockSpec(block_shape, index_map)

    def _call(single_buffer):
        return pl.pallas_call(
            kernel,
            out_shape=(
                jax.ShapeDtypeStruct((B, c_pad), jnp.float32),   # hat_y (padded C)
                jax.ShapeDtypeStruct((B, d_pad), jnp.float32),   # z     (padded D)
            ),
            grid=grid,
            in_specs=[
                pl.BlockSpec(memory_space=pltpu.SMEM),               # 1/temperature
                pl.BlockSpec((TB, F), lambda i: (i, 0)),             # activations
                _resident_spec((F, d_pad), single_buffer),           # mlp weight
                _resident_spec((1, d_pad), single_buffer),           # mlp bias
                _resident_spec((d_pad, c_pad), single_buffer),       # prototypes
            ],
            out_specs=(
                pl.BlockSpec((TB, c_pad), lambda i: (i, 0)),         # hat_y
                pl.BlockSpec((TB, d_pad), lambda i: (i, 0)),         # z
            ),
            compiler_params=pltpu.CompilerParams(
                dimension_semantics=("parallel",),
                vmem_limit_bytes=vmem_limit),
        )(params["inv_temp"], x, params["w_mlp_t"], params["b_mlp"],
          params["w_proto"])

    if single_buffer_weights and _SUPPORTS_PIPELINE_MODE:
        try:
            hat_y, z = _call(True)
        except Exception:  # fall back if Buffered(1) is rejected by this JAX build
            hat_y, z = _call(False)
    else:
        hat_y, z = _call(False)

    if c_pad != C:
        hat_y = hat_y[:, :C]
    if d_pad != D:
        z = z[:, :D]
    return hat_y, z


def discrete_decoder(e_xk, w_mlp, b_mlp, w_proto, temperature,
                     smoothing_factor=0.1, *, block_b=1024,
                     compute_dtype=jnp.bfloat16, approx_reciprocal=True):
    """Convenience wrapper: prepare params + apply.  For repeated calls,
    call prepare_discrete_decoder_params() once and reuse the result."""
    params = prepare_discrete_decoder_params(w_mlp, b_mlp, w_proto, temperature,
                                             compute_dtype=compute_dtype)
    return discrete_decoder_apply(params, e_xk, smoothing_factor,
                                  block_b=block_b,
                                  approx_reciprocal=approx_reciprocal)


def _reference(e_xk, w_mlp, b_mlp, w_proto, temperature, alpha,
               compute_dtype=jnp.float32):
    """Pure-JAX reference mirroring the PyTorch forward.  compute_dtype lets the
    test reproduce the kernel's bf16 streaming for a tight comparison."""
    x = jnp.squeeze(e_xk, axis=1)
    xc = x.astype(compute_dtype).astype(jnp.float32)
    wc = jnp.asarray(w_mlp, jnp.float32).astype(compute_dtype).astype(jnp.float32)
    pc = jnp.asarray(w_proto, jnp.float32).astype(compute_dtype).astype(jnp.float32)
    z = xc @ wc.T + b_mlp
    zc = z.astype(compute_dtype).astype(jnp.float32)
    logits = (zc @ pc) / temperature
    s = jax.nn.softmax(logits, axis=-1)
    hat_y = (1.0 - alpha) * s + alpha / s.shape[-1]
    return hat_y, z


if __name__ == "__main__":
    key = jax.random.PRNGKey(0)
    k1, k2, k3, k4 = jax.random.split(key, 4)

    # b=2, s=4 -> B = b*s = 8; feature_dim=32, output_dim=32, num_classes=16
    B, F, D, C = 8, 32, 32, 16
    alpha = 0.1

    e_xk = jax.random.normal(k1, (B, 1, F), dtype=jnp.float32)
    w_mlp = (jax.random.uniform(k2, (D, F), dtype=jnp.float32) - 0.5) * (
        2.0 / jnp.sqrt(jnp.float32(F)))
    b_mlp = (jax.random.uniform(k3, (D,), dtype=jnp.float32) - 0.5) * 0.1
    w_proto = (jax.random.uniform(k4, (D, C), dtype=jnp.float32) - 0.5) * (
        2.0 / jnp.sqrt(jnp.float32(C)))
    temperature = jnp.float32(0.8)

    hat_y, z = discrete_decoder(e_xk, w_mlp, b_mlp, w_proto, temperature,
                                smoothing_factor=alpha)
    jax.block_until_ready((hat_y, z))

    # Tight check against a reference with matching bf16 streaming, loose check
    # against the pure-f32 PyTorch semantics.
    ref_hat_y_m, ref_z_m = _reference(e_xk, w_mlp, b_mlp, w_proto, temperature,
                                      alpha, compute_dtype=jnp.bfloat16)
    ref_hat_y_f, ref_z_f = _reference(e_xk, w_mlp, b_mlp, w_proto, temperature,
                                      alpha, compute_dtype=jnp.float32)

    assert hat_y.shape == (B, C) and z.shape == (B, D)
    assert jnp.allclose(hat_y, ref_hat_y_m, atol=5e-3, rtol=5e-3)
    assert jnp.allclose(z, ref_z_m, atol=5e-3, rtol=5e-3)
    assert jnp.allclose(hat_y, ref_hat_y_f, atol=1e-1)
    assert jnp.allclose(z, ref_z_f, atol=1e-1)
    assert not jnp.isnan(hat_y).any() and not jnp.isinf(hat_y).any()
    assert not jnp.isnan(z).any() and not jnp.isinf(z).any()
    # probabilities sum to 1 per row (up to approx-reciprocal error)
    assert jnp.allclose(jnp.sum(hat_y, axis=-1), 1.0, atol=5e-3)

    print("KERNEL_OK")
</pallas_src>

<mosaic_0001>
module attributes {stable_mosaic.version = 11 : i64} {
  func.func @_discrete_decoder_kernel(%arg0: i32, %arg1: memref<1xf32, #tpu.memory_space<smem>>, %arg2: memref<8x32xbf16, #tpu.memory_space<vmem>>, %arg3: memref<32x128xbf16, #tpu.memory_space<vmem>>, %arg4: memref<1x128xf32, #tpu.memory_space<vmem>>, %arg5: memref<128x128xbf16, #tpu.memory_space<vmem>>, %arg6: memref<8x128xf32, #tpu.memory_space<vmem>>, %arg7: memref<8x128xf32, #tpu.memory_space<vmem>>) attributes {dimension_semantics = [#tpu.dimension_semantics<parallel>], iteration_bounds = array<i64: 1>, scalar_prefetch = 0 : i64, scratch_operands = 0 : i64, tpu.core_type = #tpu.core_type<tc>, window_params = [{transform_indices = @transform_0, window_bounds = array<i64: 1>}, {transform_indices = @transform_1, window_bounds = array<i64: 8, 32>}, {pipeline_mode = #tpu.pipeline_mode<synchronous>, transform_indices = @transform_2, window_bounds = array<i64: 32, 128>}, {pipeline_mode = #tpu.pipeline_mode<synchronous>, transform_indices = @transform_3, window_bounds = array<i64: 1, 128>}, {pipeline_mode = #tpu.pipeline_mode<synchronous>, transform_indices = @transform_4, window_bounds = array<i64: 128, 128>}, {transform_indices = @transform_5, window_bounds = array<i64: 8, 128>}, {transform_indices = @transform_6, window_bounds = array<i64: 8, 128>}]} {
    %c0 = arith.constant 0 : index
    %c0_0 = arith.constant 0 : index
    %0 = vector.load %arg2[%c0, %c0_0] : memref<8x32xbf16, #tpu.memory_space<vmem>>, vector<8x32xbf16>
    %c0_1 = arith.constant 0 : index
    %c0_2 = arith.constant 0 : index
    %1 = vector.load %arg3[%c0_1, %c0_2] : memref<32x128xbf16, #tpu.memory_space<vmem>>, vector<32x128xbf16>
    %cst = arith.constant dense<0.000000e+00> : vector<8x128xf32>
    %2 = tpu.matmul %0, %1, %cst {dimension_numbers = #tpu.dot_dimension_numbers<[1], [0], [0], [1], [0, 0, 1, 1], [], []>} : vector<8x32xbf16>, vector<32x128xbf16>, vector<8x128xf32> -> vector<8x128xf32>
    %c0_3 = arith.constant 0 : index
    %c0_4 = arith.constant 0 : index
    %3 = vector.load %arg4[%c0_3, %c0_4] : memref<1x128xf32, #tpu.memory_space<vmem>>, vector<1x128xf32>
    %4 = vector.broadcast %3 : vector<1x128xf32> to vector<8x128xf32>
    %5 = arith.addf %2, %4 : vector<8x128xf32>
    %6 = arith.truncf %5 : vector<8x128xf32> to vector<8x128xbf16>
    %c0_5 = arith.constant 0 : index
    %c0_6 = arith.constant 0 : index
    %7 = vector.load %arg5[%c0_5, %c0_6] : memref<128x128xbf16, #tpu.memory_space<vmem>>, vector<128x128xbf16>
    %cst_7 = arith.constant dense<0.000000e+00> : vector<8x128xf32>
    %8 = tpu.matmul %6, %7, %cst_7 {dimension_numbers = #tpu.dot_dimension_numbers<[1], [0], [0], [1], [0, 0, 1, 1], [], []>} : vector<8x128xbf16>, vector<128x128xbf16>, vector<8x128xf32> -> vector<8x128xf32>
    %c0_8 = arith.constant 0 : index
    %9 = memref.load %arg1[%c0_8] : memref<1xf32, #tpu.memory_space<smem>>
    %10 = vector.broadcast %9 : f32 to vector<8x128xf32>
    %11 = arith.mulf %8, %10 : vector<8x128xf32>
    %12 = tpu.iota {dimensions = array<i32: 1>} : vector<8x128xi32>
    %c16_i32 = arith.constant 16 : i32
    %13 = vector.broadcast %c16_i32 : i32 to vector<8x128xi32>
    %14 = arith.cmpi slt, %12, %13 : vector<8x128xi32>
    %cst_9 = arith.constant 0xFF800000 : f32
    %15 = vector.broadcast %cst_9 : f32 to vector<8x128xf32>
    %16 = arith.select %14, %11, %15 : vector<8x128xi1>, vector<8x128xf32>
    %cst_10 = arith.constant dense<0xFF800000> : vector<8xf32>
    %17 = vector.multi_reduction <maximumf>, %16, %cst_10 [1] : vector<8x128xf32> to vector<8xf32>
    %18 = vector.shape_cast %17 : vector<8xf32> to vector<8x1xf32>
    %19 = vector.broadcast %18 : vector<8x1xf32> to vector<8x128xf32>
    %20 = arith.subf %16, %19 : vector<8x128xf32>
    %21 = math.exp %20 : vector<8x128xf32>
    %cst_11 = arith.constant dense<0.000000e+00> : vector<8xf32>
    %22 = vector.multi_reduction <add>, %21, %cst_11 [1] : vector<8x128xf32> to vector<8xf32>
    %23 = vector.shape_cast %22 : vector<8xf32> to vector<8x1xf32>
    %24 = tpu.reciprocal %23 {approx = true} : vector<8x1xf32> -> vector<8x1xf32>
    %cst_12 = arith.constant 0.899999976 : f32
    %25 = vector.broadcast %cst_12 : f32 to vector<8x1xf32>
    %26 = arith.mulf %25, %24 : vector<8x1xf32>
    %27 = vector.broadcast %26 : vector<8x1xf32> to vector<8x128xf32>
    %28 = arith.mulf %21, %27 : vector<8x128xf32>
    %cst_13 = arith.constant 6.250000e-03 : f32
    %29 = vector.broadcast %cst_13 : f32 to vector<8x128xf32>
    %30 = arith.addf %28, %29 : vector<8x128xf32>
    %c0_14 = arith.constant 0 : index
    %c0_15 = arith.constant 0 : index
    %31 = vector.load %arg6[%c0_14, %c0_15] : memref<8x128xf32, #tpu.memory_space<vmem>>, vector<8x128xf32>
    tpu.vector_store %arg6[%c0_14, %c0_15], %30 {strides = array<i32>} : memref<8x128xf32, #tpu.memory_space<vmem>>, vector<8x128xf32>,
    %c0_16 = arith.constant 0 : index
    %c0_17 = arith.constant 0 : index
    %32 = vector.load %arg7[%c0_16, %c0_17] : memref<8x128xf32, #tpu.memory_space<vmem>>, vector<8x128xf32>
    tpu.vector_store %arg7[%c0_16, %c0_17], %5 {strides = array<i32>} : memref<8x128xf32, #tpu.memory_space<vmem>>, vector<8x128xf32>,
    return
  }
  func.func @transform_0(%arg0: i32) -> i32 {
    %c0_i32 = arith.constant 0 : i32
    %c0_i32_0 = arith.constant 0 : i32
    return %c0_i32 : i32
  }
  func.func @transform_1(%arg0: i32) -> (i32, i32) {
    %c0_i32 = arith.constant 0 : i32
    %c0_i32_0 = arith.constant 0 : i32
    return %arg0, %c0_i32 : i32, i32
  }
  func.func @transform_2(%arg0: i32) -> (i32, i32) {
    %c0_i32 = arith.constant 0 : i32
    %c0_i32_0 = arith.constant 0 : i32
    %c0_i32_1 = arith.constant 0 : i32
    return %c0_i32, %c0_i32_0 : i32, i32
  }
  func.func @transform_3(%arg0: i32) -> (i32, i32) {
    %c0_i32 = arith.constant 0 : i32
    %c0_i32_0 = arith.constant 0 : i32
    %c0_i32_1 = arith.constant 0 : i32
    return %c0_i32, %c0_i32_0 : i32, i32
  }
  func.func @transform_4(%arg0: i32) -> (i32, i32) {
    %c0_i32 = arith.constant 0 : i32
    %c0_i32_0 = arith.constant 0 : i32
    %c0_i32_1 = arith.constant 0 : i32
    return %c0_i32, %c0_i32_0 : i32, i32
  }
  func.func @transform_5(%arg0: i32) -> (i32, i32) {
    %c0_i32 = arith.constant 0 : i32
    %c0_i32_0 = arith.constant 0 : i32
    return %arg0, %c0_i32 : i32, i32
  }
  func.func @transform_6(%arg0: i32) -> (i32, i32) {
    %c0_i32 = arith.constant 0 : i32
    %c0_i32_0 = arith.constant 0 : i32
    return %arg0, %c0_i32 : i32, i32
  }
}

module attributes {stable_mosaic.version = 11 : i64} {
  func.func @_discrete_decoder_kernel(%arg0: i32, %arg1: memref<1xf32, #tpu.memory_space<smem>>, %arg2: memref<8x32xbf16, #tpu.memory_space<vmem>>, %arg3: memref<32x128xbf16, #tpu.memory_space<vmem>>, %arg4: memref<1x128xf32, #tpu.memory_space<vmem>>, %arg5: memref<128x128xbf16, #tpu.memory_space<vmem>>, %arg6: memref<8x128xf32, #tpu.memory_space<vmem>>, %arg7: memref<8x128xf32, #tpu.memory_space<vmem>>) attributes {dimension_semantics = [#tpu.dimension_semantics<parallel>], iteration_bounds = array<i64: 1>, scalar_prefetch = 0 : i64, scratch_operands = 0 : i64, tpu.core_type = #tpu.core_type<tc>, window_params = [{transform_indices = @transform_0, window_bounds = array<i64: 1>}, {transform_indices = @transform_1, window_bounds = array<i64: 8, 32>}, {pipeline_mode = #tpu.pipeline_mode<synchronous>, transform_indices = @transform_2, window_bounds = array<i64: 32, 128>}, {pipeline_mode = #tpu.pipeline_mode<synchronous>, transform_indices = @transform_3, window_bounds = array<i64: 1, 128>}, {pipeline_mode = #tpu.pipeline_mode<synchronous>, transform_indices = @transform_4, window_bounds = array<i64: 128, 128>}, {transform_indices = @transform_5, window_bounds = array<i64: 8, 128>}, {transform_indices = @transform_6, window_bounds = array<i64: 8, 128>}]} {
    %c0 = arith.constant 0 : index
    %c0_0 = arith.constant 0 : index
    %0 = vector.load %arg2[%c0, %c0_0] : memref<8x32xbf16, #tpu.memory_space<vmem>>, vector<8x32xbf16>
    %c0_1 = arith.constant 0 : index
    %c0_2 = arith.constant 0 : index
    %1 = vector.load %arg3[%c0_1, %c0_2] : memref<32x128xbf16, #tpu.memory_space<vmem>>, vector<32x128xbf16>
    %cst = arith.constant dense<0.000000e+00> : vector<8x128xf32>
    %2 = tpu.matmul %0, %1, %cst {dimension_numbers = #tpu.dot_dimension_numbers<[1], [0], [0], [1], [0, 0, 1, 1], [], []>} : vector<8x32xbf16>, vector<32x128xbf16>, vector<8x128xf32> -> vector<8x128xf32>
    %c0_3 = arith.constant 0 : index
    %c0_4 = arith.constant 0 : index
    %3 = vector.load %arg4[%c0_3, %c0_4] : memref<1x128xf32, #tpu.memory_space<vmem>>, vector<1x128xf32>
    %4 = vector.broadcast %3 : vector<1x128xf32> to vector<8x128xf32>
    %5 = arith.addf %2, %4 : vector<8x128xf32>
    %6 = arith.truncf %5 : vector<8x128xf32> to vector<8x128xbf16>
    %c0_5 = arith.constant 0 : index
    %c0_6 = arith.constant 0 : index
    %7 = vector.load %arg5[%c0_5, %c0_6] : memref<128x128xbf16, #tpu.memory_space<vmem>>, vector<128x128xbf16>
    %cst_7 = arith.constant dense<0.000000e+00> : vector<8x128xf32>
    %8 = tpu.matmul %6, %7, %cst_7 {dimension_numbers = #tpu.dot_dimension_numbers<[1], [0], [0], [1], [0, 0, 1, 1], [], []>} : vector<8x128xbf16>, vector<128x128xbf16>, vector<8x128xf32> -> vector<8x128xf32>
    %c0_8 = arith.constant 0 : index
    %9 = memref.load %arg1[%c0_8] : memref<1xf32, #tpu.memory_space<smem>>
    %10 = vector.broadcast %9 : f32 to vector<8x128xf32>
    %11 = arith.mulf %8, %10 : vector<8x128xf32>
    %12 = tpu.iota {dimensions = array<i32: 1>} : vector<8x128xi32>
    %c16_i32 = arith.constant 16 : i32
    %13 = vector.broadcast %c16_i32 : i32 to vector<8x128xi32>
    %14 = arith.cmpi slt, %12, %13 : vector<8x128xi32>
    %cst_9 = arith.constant 0xFF800000 : f32
    %15 = vector.broadcast %cst_9 : f32 to vector<8x128xf32>
    %16 = arith.select %14, %11, %15 : vector<8x128xi1>, vector<8x128xf32>
    %cst_10 = arith.constant dense<0xFF800000> : vector<8xf32>
    %17 = vector.multi_reduction <maximumf>, %16, %cst_10 [1] : vector<8x128xf32> to vector<8xf32>
    %18 = vector.shape_cast %17 : vector<8xf32> to vector<8x1xf32>
    %19 = vector.broadcast %18 : vector<8x1xf32> to vector<8x128xf32>
    %20 = arith.subf %16, %19 : vector<8x128xf32>
    %21 = math.exp %20 : vector<8x128xf32>
    %cst_11 = arith.constant dense<0.000000e+00> : vector<8xf32>
    %22 = vector.multi_reduction <add>, %21, %cst_11 [1] : vector<8x128xf32> to vector<8xf32>
    %23 = vector.shape_cast %22 : vector<8xf32> to vector<8x1xf32>
    %24 = tpu.reciprocal %23 {approx = true} : vector<8x1xf32> -> vector<8x1xf32>
    %cst_12 = arith.constant 0.899999976 : f32
    %25 = vector.broadcast %cst_12 : f32 to vector<8x1xf32>
    %26 = arith.mulf %25, %24 : vector<8x1xf32>
    %27 = vector.broadcast %26 : vector<8x1xf32> to vector<8x128xf32>
    %28 = arith.mulf %21, %27 : vector<8x128xf32>
    %cst_13 = arith.constant 6.250000e-03 : f32
    %29 = vector.broadcast %cst_13 : f32 to vector<8x128xf32>
    %30 = arith.addf %28, %29 : vector<8x128xf32>
    %c0_14 = arith.constant 0 : index
    %c0_15 = arith.constant 0 : index
    %31 = vector.load %arg6[%c0_14, %c0_15] : memref<8x128xf32, #tpu.memory_space<vmem>>, vector<8x128xf32>
    tpu.vector_store %arg6[%c0_14, %c0_15], %30 {strides = array<i32>} : memref<8x128xf32, #tpu.memory_space<vmem>>, vector<8x128xf32>,
    %c0_16 = arith.constant 0 : index
    %c0_17 = arith.constant 0 : index
    %32 = vector.load %arg7[%c0_16, %c0_17] : memref<8x128xf32, #tpu.memory_space<vmem>>, vector<8x128xf32>
    tpu.vector_store %arg7[%c0_16, %c0_17], %5 {strides = array<i32>} : memref<8x128xf32, #tpu.memory_space<vmem>>, vector<8x128xf32>,
    return
  }
  func.func @transform_0(%arg0: i32) -> i32 {
    %c0_i32 = arith.constant 0 : i32
    %c0_i32_0 = arith.constant 0 : i32
    return %c0_i32 : i32
  }
  func.func @transform_1(%arg0: i32) -> (i32, i32) {
    %c0_i32 = arith.constant 0 : i32
    %c0_i32_0 = arith.constant 0 : i32
    return %arg0, %c0_i32 : i32, i32
  }
  func.func @transform_2(%arg0: i32) -> (i32, i32) {
    %c0_i32 = arith.constant 0 : i32
    %c0_i32_0 = arith.constant 0 : i32
    %c0_i32_1 = arith.constant 0 : i32
    return %c0_i32, %c0_i32_0 : i32, i32
  }
  func.func @transform_3(%arg0: i32) -> (i32, i32) {
    %c0_i32 = arith.constant 0 : i32
    %c0_i32_0 = arith.constant 0 : i32
    %c0_i32_1 = arith.constant 0 : i32
    return %c0_i32, %c0_i32_0 : i32, i32
  }
  func.func @transform_4(%arg0: i32) -> (i32, i32) {
    %c0_i32 = arith.constant 0 : i32
    %c0_i32_0 = arith.constant 0 : i32
    %c0_i32_1 = arith.constant 0 : i32
    return %c0_i32, %c0_i32_0 : i32, i32
  }
  func.func @transform_5(%arg0: i32) -> (i32, i32) {
    %c0_i32 = arith.constant 0 : i32
    %c0_i32_0 = arith.constant 0 : i32
    return %arg0, %c0_i32 : i32, i32
  }
  func.func @transform_6(%arg0: i32) -> (i32, i32) {
    %c0_i32 = arith.constant 0 : i32
    %c0_i32_0 = arith.constant 0 : i32
    return %arg0, %c0_i32 : i32, i32
  }
}

</mosaic_0001>

<bundles_post_ra>
// kernel: tpu_custom_call.1
= control target key start
LH: loop header
LB: loop body
LE: loop exit
PB: predicated region body
PF: predicated region fallthrough
CT: control target
= control target key end

     0   :  { %13 = vsyncpa [#allocation4], 0  ;;  %s597_s0 = inlined_call_operand.<no memory space> [shape: f32[1], index: 0, kind: input, shape index: {}]   ;;  %s598_s1 = inlined_call_operand.hbm [shape: bf16[8,32], index: 1, kind: input, shape index: {}]   ;;  %s599_s2 = inlined_call_operand.hbm [shape: bf16[32,128], index: 2, kind: input, shape index: {}]   ;;  %s600_s3 = inlined_call_operand.vmem [shape: f32[1,128], index: 3, kind: input, shape index: {}]   ;;  %s601_s4 = inlined_call_operand.hbm [shape: bf16[128,128], index: 4, kind: input, shape index: {}]   ;;  %s602_s5 = inlined_call_operand.hbm [shape: f32[8,128], index: 5, kind: output, shape index: {0}]   ;;  %s603_s6 = inlined_call_operand.hbm [shape: f32[8,128], index: 6, kind: output, shape index: {1}]  }
   0x1   :  { %14 = vsyncpa [#allocation7], 0 }
   0x2   :  { %15 = vsyncpa [#allocation5], 0 }
   0x3   :  { %16 = vsyncpa [#allocation11], 0  ;;  %s481_s21 = smov [#allocation6]   ;;  %s363_s25 = scalar_lea.hbm %s599_s2, 256 }
   0x4   :  { %s34_s22 = sshll.u32 %s481_s21, 4  ;;  %p364_p0 = scmp.ne.s32.totalorder %s599_s2, %s363_s25  ;;  %s35_s22 = int_to_ptr.vmem [resolvable:$true] %s34_s22 }
   0x5   :  { %p367_p1 = scmp.lt.u32.totalorder %s363_s25, %s599_s2 }
   0x7   :  { %p369_p2 = pnand %p367_p1, %p364_p0 }
   0x9   :  { %372 = shalt.err (!%p369_p2)
}
   0xa   :  { %s373_s30 = scalar_lea.vmem %s35_s22, 256  ;;  %p378_p4 = scmp.lt.s32.totalorder %s35_s22, %s35_s22 }
   0xb   :  { %p374_p3 = scmp.ne.s32.totalorder %s35_s22, %s373_s30  ;;  %p379_p5 = scmp.lt.s32.totalorder %s373_s30, %s373_s30 }
   0xd   :  { %p380_p6 = por %p379_p5, %p378_p4 }
   0xf   :  { %p381_p7 = pnand %p380_p6, %p374_p3 }
  0x11   :  { %384 = shalt.err (!%p381_p7)
}
  0x12   :  { %s482_s7 = smov 64   ;;  %s483_s8 = smov 4  }
  0x13   :  { %40 = dma.hbm_to_vmem [thread:$0]  %s599_s2, 256, %s35_s22, [#allocation7], %s482_s7, %s482_s7, %s483_s8  }
  0x14   :  { %s484_s11 = smov [#allocation3]   ;;  %s485_s13 = smov [#allocation8]  }
  0x15   :  { %s25_s12 = sshll.u32 %s484_s11, 4  ;;  %s48_s14 = sshll.u32 %s485_s13, 4  ;;  %s26_s12 = int_to_ptr.vmem [resolvable:$true] %s25_s12  ;;  %s49_s14 = int_to_ptr.vmem [resolvable:$true] %s48_s14 }
  0x16   :  { %s385_s17 = scalar_lea.hbm %s598_s1, 64 }
  0x17   :  { %p386_p8 = scmp.ne.s32.totalorder %s598_s1, %s385_s17  ;;  %p389_p9 = scmp.lt.u32.totalorder %s385_s17, %s598_s1 }
  0x19   :  { %p391_p10 = pnand %p389_p9, %p386_p8 }
  0x1b   :  { %394 = shalt.err (!%p391_p10)
}
  0x1c   :  { %s395_s2 = scalar_lea.vmem %s26_s12, 64  ;;  %p400_p12 = scmp.lt.s32.totalorder %s26_s12, %s26_s12 }
  0x1d   :  { %p396_p11 = scmp.ne.s32.totalorder %s26_s12, %s395_s2  ;;  %p401_p13 = scmp.lt.s32.totalorder %s395_s2, %s395_s2 }
  0x1f   :  { %p402_p0 = por %p401_p13, %p400_p12 }
  0x21   :  { %p403_p1 = pnand %p402_p0, %p396_p11 }
  0x23   :  { %406 = shalt.err (!%p403_p1)
}
  0x24   :  { %28 = dma.hbm_to_vmem [thread:$0]  %s598_s1, 64, %s26_s12, [#allocation4]  }
  0x25   :  { %s407_s26 = scalar_lea.hbm %s601_s4, 1024 }
  0x26   :  { %p408_p2 = scmp.ne.s32.totalorder %s601_s4, %s407_s26  ;;  %p411_p3 = scmp.lt.u32.totalorder %s407_s26, %s601_s4 }
  0x28   :  { %p413_p4 = pnand %p411_p3, %p408_p2 }
  0x2a   :  { %416 = shalt.err (!%p413_p4)
}
  0x2b   :  { %s417_s9 = scalar_lea.vmem %s49_s14, 1024  ;;  %p422_p6 = scmp.lt.s32.totalorder %s49_s14, %s49_s14 }
  0x2c   :  { %p418_p5 = scmp.ne.s32.totalorder %s49_s14, %s417_s9  ;;  %p423_p7 = scmp.lt.s32.totalorder %s417_s9, %s417_s9 }
  0x2e   :  { %p424_p8 = por %p423_p7, %p422_p6 }
  0x30   :  { %p425_p9 = pnand %p424_p8, %p418_p5 }
  0x32   :  { %428 = shalt.err (!%p425_p9)
}
  0x33   :  { %54 = dma.hbm_to_vmem [thread:$0]  %s601_s4, 1024, %s49_s14, [#allocation7], %s482_s7, %s482_s7, %s483_s8  }
  0x34   :  { %473 = dma.done.wait [#allocation4], 64  }
  0x35   :  { %474 = vsyncadd [#allocation4], 4294967232 }
  0x36   :  { %475 = dma.done.wait [#allocation7], 1280  }
  0x37   :  { %476 = vsyncadd [#allocation7], 4294966016  ;;  %v486_v0 = vmov 0.0   ;;  %vm487_vm0 = vmmov 0   ;;  %v349_v1 = vld [vmem:[#allocation6] sm:$0xff]   ;;  %v350_v2 = vld [vmem:[#allocation6 + $0x8] sm:$0xff]   ;;  %v241_v19 = vlaneseq  ;;  %v239_v21 = vstv %s597_s0 }
  0x38   :  { %312 = vmatprep.subr.bf16.mxu0 %v486_v0  ;;  %316 = vmatprep.mubr.msk.bf16.mxu0 %vm487_vm0, %v486_v0  ;;  %v351_v3 = vld [vmem:[#allocation8] sm:$0xff]   ;;  %vm89_vm1 = vcmask 261120   ;;  %v352_v4 = vld [vmem:[#allocation8 + $0x8] sm:$0xff]   ;;  %v353_v6 = vld [vmem:[#allocation8 + $0x10] sm:$0xff]  }
  0x39   :  { %320 = vmatprep.subr.bf16.mxu1 %v486_v0  ;;  %336 = vmatprep.mubr.msk.bf16.mxu1 %vm487_vm0, %v486_v0  ;;  %v65_v5 = vld [vmem:[#allocation3] sm:$0xf]  ;;  %v354_v7 = vld [vmem:[#allocation8 + $0x18] sm:$0xff]   ;;  %v355_v8 = vld [vmem:[#allocation8 + $0x20] sm:$0xff]   ;;  %v242_v20 = vand.u32 127, %v241_v19 }
  0x3a   :  { %313 = vmatpush3.bf16.msra.mxu0 %v349_v1  ;;  %321 = vmatpush3.bf16.msra.mxu1 %v351_v3  ;;  %v356_v9 = vld [vmem:[#allocation8 + $0x28] sm:$0xff]   ;;  %v357_v10 = vld [vmem:[#allocation8 + $0x30] sm:$0xff]   ;;  %v358_v11 = vld [vmem:[#allocation8 + $0x38] sm:$0xff]  }
  0x3b   :  { %314 = vmatprep.subr.bf16.mxu0 %v486_v0  ;;  %322 = vmatprep.subr.bf16.mxu1 %v486_v0  ;;  %v288_v12 = vld [vmem:[%s600_s3] ss:$0 sm:$0xff]  ;;  %vm243_vm2 = vcmp.lt.s32.totalorder %v242_v20, 16  ;;  %s488_s3 = smov [#allocation10]  }
  0x3c   :  { %s274_s12 = sshll.u32 %s488_s3, 4  ;;  %s275_s12 = int_to_ptr.vmem [resolvable:$true] %s274_s12 }
  0x3d   :  { %s429_s13 = scalar_lea.vmem %s275_s12, 128  ;;  %p434_p11 = scmp.lt.s32.totalorder %s275_s12, %s275_s12 }
  0x3e   :  { %315 = vmatpush3.bf16.msra.mxu0 %v350_v2  ;;  %323 = vmatpush3.bf16.msra.mxu1 %v352_v4  ;;  %p430_p10 = scmp.ne.s32.totalorder %s275_s12, %s429_s13  ;;  %p435_p12 = scmp.lt.s32.totalorder %s429_s13, %s429_s13 }
  0x3f   :  { %324 = vmatprep.subr.bf16.mxu1 %v486_v0 }
  0x40   :  { %p436_p13 = por %p435_p12, %p434_p11 }
  0x41   :  { %317 = vmatmul.mubr.msk.bf16.vlgmr.msra.gmra.mrb[0].mxu0 %vm89_vm1, %v65_v5 }
  0x42   :  { %325 = vmatpush3.bf16.msra.mxu1 %v353_v6  ;;  %p437_p0 = pnand %p436_p13, %p430_p10 }
  0x43   :  { %326 = vmatprep.subr.bf16.mxu1 %v486_v0 }
  0x46   :  { %327 = vmatpush3.bf16.msra.mxu1 %v354_v7 }
  0x47   :  { %328 = vmatprep.subr.bf16.mxu1 %v486_v0 }
  0x4a   :  { %329 = vmatpush3.bf16.msra.mxu1 %v355_v8 }
  0x4b   :  { %330 = vmatprep.subr.bf16.mxu1 %v486_v0 }
  0x4e   :  { %331 = vmatpush3.bf16.msra.mxu1 %v356_v9 }
  0x4f   :  { %332 = vmatprep.subr.bf16.mxu1 %v486_v0 }
  0x52   :  { %333 = vmatpush3.bf16.msra.mxu1 %v357_v10 }
  0x53   :  { %334 = vmatprep.subr.bf16.mxu1 %v486_v0 }
  0x56   :  { %335 = vmatpush3.bf16.msra.mxu1 %v358_v11 }
 0x114   :  { %v127_v13 = vpop.f32.mrb[0].mxu0 }
 0x115   :  { %v128_v14 = vadd.f32 %v288_v12, %v127_v13  ;;  %v318_v15 = vpop.f32.mrb[1].mxu0 }
 0x116   :  { %v130_v16 = vpop.f32.mrb[2].mxu0 }
 0x117   :  { %v133_v17 = vpack.c.bf16 %v128_v14, %v128_v14  ;;  %257 = vst [vmem:[#allocation10] sm:$0xff] %v128_v14  ;;  %v319_v18 = vpop.f32.mrb[3].mxu0 }
 0x119   :  { %337 = vmatmul.mubr.bf16.vlgmr.msra.gmra.mrb[0].mxu1 %v133_v17 }
 0x1ec   :  { %v232_v22 = vpop.f32.mrb[0].mxu1 }
 0x1ed   :  { %v240_v23 = vmul.f32 %v239_v21, %v232_v22  ;;  %v338_v24 = vpop.f32.mrb[1].mxu1 }
 0x1ee   :  { %v235_v25 = vpop.f32.mrb[2].mxu1 }
 0x1ef   :  { %v339_v26 = vpop.f32.mrb[3].mxu1  ;;  %v244_v27 = vsel %vm243_vm2, %v240_v23, -inf }
 0x1f0   :  { %245 = vmax.xlane.f32.xlu0 %v244_v27 }
 0x27d   :  { %v246_v28 = vpop.xlane.xlu0 %245 }
 0x27e   :  { %v247_v29 = vsub.f32 %v244_v27, %v246_v28 }
 0x280   :  { %v248_v30 = vmul.f32 1.442695, %v247_v29 }
 0x282   :  { %359 = vpow2.f32 %v248_v30 }
 0x28c   :  { %v360_v31 = vpop.eup %359 }
 0x28d   :  { %250 = vadd.xlane.f32.xlu0 %v360_v31 }
 0x28e   :  { %440 = shalt.err (!%p437_p0)
}
 0x28f   :  { %s441_s15 = scalar_lea.hbm %s603_s6, 128 }
 0x290   :  { %p442_p1 = scmp.ne.s32.totalorder %s603_s6, %s441_s15  ;;  %p445_p2 = scmp.lt.u32.totalorder %s441_s15, %s603_s6 }
 0x292   :  { %p447_p3 = pnand %p445_p2, %p442_p1 }
 0x294   :  { %450 = shalt.err (!%p447_p3)
}
 0x295   :  { %277 = dma.vmem_to_hbm [thread:$0]  %s275_s12, 128, %s603_s6, [#allocation11]  }
 0x296   :  { %s489_s2 = smov [#allocation9]  }
 0x297   :  { %s264_s22 = sshll.u32 %s489_s2, 4  ;;  %s265_s22 = int_to_ptr.vmem [resolvable:$true] %s264_s22 }
 0x298   :  { %s451_s23 = scalar_lea.vmem %s265_s22, 128  ;;  %p456_p5 = scmp.lt.s32.totalorder %s265_s22, %s265_s22 }
 0x299   :  { %p452_p4 = scmp.ne.s32.totalorder %s265_s22, %s451_s23  ;;  %p457_p6 = scmp.lt.s32.totalorder %s451_s23, %s451_s23 }
 0x29b   :  { %p458_p7 = por %p457_p6, %p456_p5 }
 0x29d   :  { %p459_p8 = pnand %p458_p7, %p452_p4 }
 0x31a   :  { %v251_v32 = vpop.xlane.xlu0 %250 }
 0x31b   :  { %361 = vrcp.f32 %v251_v32 }
 0x325   :  { %v362_v33 = vpop.eup %361 }
 0x326   :  { %v253_v34 = vmul.f32 0.9, %v362_v33 }
 0x328   :  { %v254_v35 = vmul.f32 %v360_v31, %v253_v34 }
 0x32a   :  { %v255_v36 = vadd.f32 0.00625, %v254_v35 }
 0x32c   :  { %256 = vst [vmem:[#allocation9] sm:$0xff] %v255_v36 }
 0x32d   :  { %462 = shalt.err (!%p459_p8)
}
 0x32e   :  { %s463_s6 = scalar_lea.hbm %s602_s5, 128 }
 0x32f   :  { %p464_p9 = scmp.ne.s32.totalorder %s602_s5, %s463_s6  ;;  %p467_p10 = scmp.lt.u32.totalorder %s463_s6, %s602_s5 }
 0x331   :  { %p469_p11 = pnand %p467_p10, %p464_p9 }
 0x333   :  { %472 = shalt.err (!%p469_p11)
}
 0x334   :  { %267 = dma.vmem_to_hbm [thread:$0]  %s265_s22, 128, %s602_s5, [#allocation5]  }
 0x335   :  { %477 = dma.done.wait [#allocation5], 128  }
 0x336   :  { %478 = vsyncadd [#allocation5], 4294967168 }
 0x337   :  { %479 = dma.done.wait [#allocation11], 128  }
 0x338   :  { %480 = vsyncadd [#allocation11], 4294967168 }
 0x339   :  { %284 = vsyncpa [#allocation4], 1 }
 0x33a   :  { %285 = vsyncpa [#allocation7], 1 }
 0x33b   :  { %286 = vsyncpa [#allocation5], 1 }
 0x33c   :  { %287 = vsyncpa [#allocation11], 1 }

// kernel: tpu_custom_call.1
= control target key start
LH: loop header
LB: loop body
LE: loop exit
PB: predicated region body
PF: predicated region fallthrough
CT: control target
= control target key end

     0   :  { %13 = vsyncpa [#allocation4], 0  ;;  %s597_s0 = inlined_call_operand.<no memory space> [shape: f32[1], index: 0, kind: input, shape index: {}]   ;;  %s598_s1 = inlined_call_operand.hbm [shape: bf16[8,32], index: 1, kind: input, shape index: {}]   ;;  %s599_s2 = inlined_call_operand.hbm [shape: bf16[32,128], index: 2, kind: input, shape index: {}]   ;;  %s600_s3 = inlined_call_operand.vmem [shape: f32[1,128], index: 3, kind: input, shape index: {}]   ;;  %s601_s4 = inlined_call_operand.hbm [shape: bf16[128,128], index: 4, kind: input, shape index: {}]   ;;  %s602_s5 = inlined_call_operand.hbm [shape: f32[8,128], index: 5, kind: output, shape index: {0}]   ;;  %s603_s6 = inlined_call_operand.hbm [shape: f32[8,128], index: 6, kind: output, shape index: {1}]  }
   0x1   :  { %14 = vsyncpa [#allocation7], 0 }
   0x2   :  { %15 = vsyncpa [#allocation5], 0 }
   0x3   :  { %16 = vsyncpa [#allocation11], 0  ;;  %s481_s21 = smov [#allocation6]   ;;  %s363_s25 = scalar_lea.hbm %s599_s2, 256 }
   0x4   :  { %s34_s22 = sshll.u32 %s481_s21, 4  ;;  %p364_p0 = scmp.ne.s32.totalorder %s599_s2, %s363_s25  ;;  %s35_s22 = int_to_ptr.vmem [resolvable:$true] %s34_s22 }
   0x5   :  { %p367_p1 = scmp.lt.u32.totalorder %s363_s25, %s599_s2 }
   0x7   :  { %p369_p2 = pnand %p367_p1, %p364_p0 }
   0x9   :  { %372 = shalt.err (!%p369_p2)
}
   0xa   :  { %s373_s30 = scalar_lea.vmem %s35_s22, 256  ;;  %p378_p4 = scmp.lt.s32.totalorder %s35_s22, %s35_s22 }
   0xb   :  { %p374_p3 = scmp.ne.s32.totalorder %s35_s22, %s373_s30  ;;  %p379_p5 = scmp.lt.s32.totalorder %s373_s30, %s373_s30 }
   0xd   :  { %p380_p6 = por %p379_p5, %p378_p4 }
   0xf   :  { %p381_p7 = pnand %p380_p6, %p374_p3 }
  0x11   :  { %384 = shalt.err (!%p381_p7)
}
  0x12   :  { %s482_s7 = smov 64   ;;  %s483_s8 = smov 4  }
  0x13   :  { %40 = dma.hbm_to_vmem [thread:$0]  %s599_s2, 256, %s35_s22, [#allocation7], %s482_s7, %s482_s7, %s483_s8  }
  0x14   :  { %s484_s11 = smov [#allocation3]   ;;  %s485_s13 = smov [#allocation8]  }
  0x15   :  { %s25_s12 = sshll.u32 %s484_s11, 4  ;;  %s48_s14 = sshll.u32 %s485_s13, 4  ;;  %s26_s12 = int_to_ptr.vmem [resolvable:$true] %s25_s12  ;;  %s49_s14 = int_to_ptr.vmem [resolvable:$true] %s48_s14 }
  0x16   :  { %s385_s17 = scalar_lea.hbm %s598_s1, 64 }
  0x17   :  { %p386_p8 = scmp.ne.s32.totalorder %s598_s1, %s385_s17  ;;  %p389_p9 = scmp.lt.u32.totalorder %s385_s17, %s598_s1 }
  0x19   :  { %p391_p10 = pnand %p389_p9, %p386_p8 }
  0x1b   :  { %394 = shalt.err (!%p391_p10)
}
  0x1c   :  { %s395_s2 = scalar_lea.vmem %s26_s12, 64  ;;  %p400_p12 = scmp.lt.s32.totalorder %s26_s12, %s26_s12 }
  0x1d   :  { %p396_p11 = scmp.ne.s32.totalorder %s26_s12, %s395_s2  ;;  %p401_p13 = scmp.lt.s32.totalorder %s395_s2, %s395_s2 }
  0x1f   :  { %p402_p0 = por %p401_p13, %p400_p12 }
  0x21   :  { %p403_p1 = pnand %p402_p0, %p396_p11 }
  0x23   :  { %406 = shalt.err (!%p403_p1)
}
  0x24   :  { %28 = dma.hbm_to_vmem [thread:$0]  %s598_s1, 64, %s26_s12, [#allocation4]  }
  0x25   :  { %s407_s26 = scalar_lea.hbm %s601_s4, 1024 }
  0x26   :  { %p408_p2 = scmp.ne.s32.totalorder %s601_s4, %s407_s26  ;;  %p411_p3 = scmp.lt.u32.totalorder %s407_s26, %s601_s4 }
  0x28   :  { %p413_p4 = pnand %p411_p3, %p408_p2 }
  0x2a   :  { %416 = shalt.err (!%p413_p4)
}
  0x2b   :  { %s417_s9 = scalar_lea.vmem %s49_s14, 1024  ;;  %p422_p6 = scmp.lt.s32.totalorder %s49_s14, %s49_s14 }
  0x2c   :  { %p418_p5 = scmp.ne.s32.totalorder %s49_s14, %s417_s9  ;;  %p423_p7 = scmp.lt.s32.totalorder %s417_s9, %s417_s9 }
  0x2e   :  { %p424_p8 = por %p423_p7, %p422_p6 }
  0x30   :  { %p425_p9 = pnand %p424_p8, %p418_p5 }
  0x32   :  { %428 = shalt.err (!%p425_p9)
}
  0x33   :  { %54 = dma.hbm_to_vmem [thread:$0]  %s601_s4, 1024, %s49_s14, [#allocation7], %s482_s7, %s482_s7, %s483_s8  }
  0x34   :  { %473 = dma.done.wait [#allocation4], 64  }
  0x35   :  { %474 = vsyncadd [#allocation4], 4294967232 }
  0x36   :  { %475 = dma.done.wait [#allocation7], 1280  }
  0x37   :  { %476 = vsyncadd [#allocation7], 4294966016  ;;  %v486_v0 = vmov 0.0   ;;  %vm487_vm0 = vmmov 0   ;;  %v349_v1 = vld [vmem:[#allocation6] sm:$0xff]   ;;  %v350_v2 = vld [vmem:[#allocation6 + $0x8] sm:$0xff]   ;;  %v241_v19 = vlaneseq  ;;  %v239_v21 = vstv %s597_s0 }
  0x38   :  { %312 = vmatprep.subr.bf16.mxu0 %v486_v0  ;;  %316 = vmatprep.mubr.msk.bf16.mxu0 %vm487_vm0, %v486_v0  ;;  %v351_v3 = vld [vmem:[#allocation8] sm:$0xff]   ;;  %vm89_vm1 = vcmask 261120   ;;  %v352_v4 = vld [vmem:[#allocation8 + $0x8] sm:$0xff]   ;;  %v353_v6 = vld [vmem:[#allocation8 + $0x10] sm:$0xff]  }
  0x39   :  { %320 = vmatprep.subr.bf16.mxu1 %v486_v0  ;;  %336 = vmatprep.mubr.msk.bf16.mxu1 %vm487_vm0, %v486_v0  ;;  %v65_v5 = vld [vmem:[#allocation3] sm:$0xf]  ;;  %v354_v7 = vld [vmem:[#allocation8 + $0x18] sm:$0xff]   ;;  %v355_v8 = vld [vmem:[#allocation8 + $0x20] sm:$0xff]   ;;  %v242_v20 = vand.u32 127, %v241_v19 }
  0x3a   :  { %313 = vmatpush3.bf16.msra.mxu0 %v349_v1  ;;  %321 = vmatpush3.bf16.msra.mxu1 %v351_v3  ;;  %v356_v9 = vld [vmem:[#allocation8 + $0x28] sm:$0xff]   ;;  %v357_v10 = vld [vmem:[#allocation8 + $0x30] sm:$0xff]   ;;  %v358_v11 = vld [vmem:[#allocation8 + $0x38] sm:$0xff]  }
  0x3b   :  { %314 = vmatprep.subr.bf16.mxu0 %v486_v0  ;;  %322 = vmatprep.subr.bf16.mxu1 %v486_v0  ;;  %v288_v12 = vld [vmem:[%s600_s3] ss:$0 sm:$0xff]  ;;  %vm243_vm2 = vcmp.lt.s32.totalorder %v242_v20, 16  ;;  %s488_s3 = smov [#allocation10]  }
  0x3c   :  { %s274_s12 = sshll.u32 %s488_s3, 4  ;;  %s275_s12 = int_to_ptr.vmem [resolvable:$true] %s274_s12 }
  0x3d   :  { %s429_s13 = scalar_lea.vmem %s275_s12, 128  ;;  %p434_p11 = scmp.lt.s32.totalorder %s275_s12, %s275_s12 }
  0x3e   :  { %315 = vmatpush3.bf16.msra.mxu0 %v350_v2  ;;  %323 = vmatpush3.bf16.msra.mxu1 %v352_v4  ;;  %p430_p10 = scmp.ne.s32.totalorder %s275_s12, %s429_s13  ;;  %p435_p12 = scmp.lt.s32.totalorder %s429_s13, %s429_s13 }
  0x3f   :  { %324 = vmatprep.subr.bf16.mxu1 %v486_v0 }
  0x40   :  { %p436_p13 = por %p435_p12, %p434_p11 }
  0x41   :  { %317 = vmatmul.mubr.msk.bf16.vlgmr.msra.gmra.mrb[0].mxu0 %vm89_vm1, %v65_v5 }
  0x42   :  { %325 = vmatpush3.bf16.msra.mxu1 %v353_v6  ;;  %p437_p0 = pnand %p436_p13, %p430_p10 }
  0x43   :  { %326 = vmatprep.subr.bf16.mxu1 %v486_v0 }
  0x46   :  { %327 = vmatpush3.bf16.msra.mxu1 %v354_v7 }
  0x47   :  { %328 = vmatprep.subr.bf16.mxu1 %v486_v0 }
  0x4a   :  { %329 = vmatpush3.bf16.msra.mxu1 %v355_v8 }
  0x4b   :  { %330 = vmatprep.subr.bf16.mxu1 %v486_v0 }
  0x4e   :  { %331 = vmatpush3.bf16.msra.mxu1 %v356_v9 }
  0x4f   :  { %332 = vmatprep.subr.bf16.mxu1 %v486_v0 }
  0x52   :  { %333 = vmatpush3.bf16.msra.mxu1 %v357_v10 }
  0x53   :  { %334 = vmatprep.subr.bf16.mxu1 %v486_v0 }
  0x56   :  { %335 = vmatpush3.bf16.msra.mxu1 %v358_v11 }
 0x114   :  { %v127_v13 = vpop.f32.mrb[0].mxu0 }
 0x115   :  { %v128_v14 = vadd.f32 %v288_v12, %v127_v13  ;;  %v318_v15 = vpop.f32.mrb[1].mxu0 }
 0x116   :  { %v130_v16 = vpop.f32.mrb[2].mxu0 }
 0x117   :  { %v133_v17 = vpack.c.bf16 %v128_v14, %v128_v14  ;;  %257 = vst [vmem:[#allocation10] sm:$0xff] %v128_v14  ;;  %v319_v18 = vpop.f32.mrb[3].mxu0 }
 0x119   :  { %337 = vmatmul.mubr.bf16.vlgmr.msra.gmra.mrb[0].mxu1 %v133_v17 }
 0x1ec   :  { %v232_v22 = vpop.f32.mrb[0].mxu1 }
 0x1ed   :  { %v240_v23 = vmul.f32 %v239_v21, %v232_v22  ;;  %v338_v24 = vpop.f32.mrb[1].mxu1 }
 0x1ee   :  { %v235_v25 = vpop.f32.mrb[2].mxu1 }
 0x1ef   :  { %v339_v26 = vpop.f32.mrb[3].mxu1  ;;  %v244_v27 = vsel %vm243_vm2, %v240_v23, -inf }
 0x1f0   :  { %245 = vmax.xlane.f32.xlu0 %v244_v27 }
 0x27d   :  { %v246_v28 = vpop.xlane.xlu0 %245 }
 0x27e   :  { %v247_v29 = vsub.f32 %v244_v27, %v246_v28 }
 0x280   :  { %v248_v30 = vmul.f32 1.442695, %v247_v29 }
 0x282   :  { %359 = vpow2.f32 %v248_v30 }
 0x28c   :  { %v360_v31 = vpop.eup %359 }
 0x28d   :  { %250 = vadd.xlane.f32.xlu0 %v360_v31 }
 0x28e   :  { %440 = shalt.err (!%p437_p0)
}
 0x28f   :  { %s441_s15 = scalar_lea.hbm %s603_s6, 128 }
 0x290   :  { %p442_p1 = scmp.ne.s32.totalorder %s603_s6, %s441_s15  ;;  %p445_p2 = scmp.lt.u32.totalorder %s441_s15, %s603_s6 }
 0x292   :  { %p447_p3 = pnand %p445_p2, %p442_p1 }
 0x294   :  { %450 = shalt.err (!%p447_p3)
}
 0x295   :  { %277 = dma.vmem_to_hbm [thread:$0]  %s275_s12, 128, %s603_s6, [#allocation11]  }
 0x296   :  { %s489_s2 = smov [#allocation9]  }
 0x297   :  { %s264_s22 = sshll.u32 %s489_s2, 4  ;;  %s265_s22 = int_to_ptr.vmem [resolvable:$true] %s264_s22 }
 0x298   :  { %s451_s23 = scalar_lea.vmem %s265_s22, 128  ;;  %p456_p5 = scmp.lt.s32.totalorder %s265_s22, %s265_s22 }
 0x299   :  { %p452_p4 = scmp.ne.s32.totalorder %s265_s22, %s451_s23  ;;  %p457_p6 = scmp.lt.s32.totalorder %s451_s23, %s451_s23 }
 0x29b   :  { %p458_p7 = por %p457_p6, %p456_p5 }
 0x29d   :  { %p459_p8 = pnand %p458_p7, %p452_p4 }
 0x31a   :  { %v251_v32 = vpop.xlane.xlu0 %250 }
 0x31b   :  { %361 = vrcp.f32 %v251_v32 }
 0x325   :  { %v362_v33 = vpop.eup %361 }
 0x326   :  { %v253_v34 = vmul.f32 0.9, %v362_v33 }
 0x328   :  { %v254_v35 = vmul.f32 %v360_v31, %v253_v34 }
 0x32a   :  { %v255_v36 = vadd.f32 0.00625, %v254_v35 }
 0x32c   :  { %256 = vst [vmem:[#allocation9] sm:$0xff] %v255_v36 }
 0x32d   :  { %462 = shalt.err (!%p459_p8)
}
 0x32e   :  { %s463_s6 = scalar_lea.hbm %s602_s5, 128 }
 0x32f   :  { %p464_p9 = scmp.ne.s32.totalorder %s602_s5, %s463_s6  ;;  %p467_p10 = scmp.lt.u32.totalorder %s463_s6, %s602_s5 }
 0x331   :  { %p469_p11 = pnand %p467_p10, %p464_p9 }
 0x333   :  { %472 = shalt.err (!%p469_p11)
}
 0x334   :  { %267 = dma.vmem_to_hbm [thread:$0]  %s265_s22, 128, %s602_s5, [#allocation5]  }
 0x335   :  { %477 = dma.done.wait [#allocation5], 128  }
 0x336   :  { %478 = vsyncadd [#allocation5], 4294967168 }
 0x337   :  { %479 = dma.done.wait [#allocation11], 128  }
 0x338   :  { %480 = vsyncadd [#allocation11], 4294967168 }
 0x339   :  { %284 = vsyncpa [#allocation4], 1 }
 0x33a   :  { %285 = vsyncpa [#allocation7], 1 }
 0x33b   :  { %286 = vsyncpa [#allocation5], 1 }
 0x33c   :  { %287 = vsyncpa [#allocation11], 1 }

</bundles_post_ra>
